<compile_context>
chip_gen: v7x
topology: tpu7x:2x2x1
jax: 0.10.0
libtpu: 0.0.40
codegen_flags: <defaults>
</compile_context>

<pallas_src>
import functools

import jax
import jax.numpy as jnp
from jax.experimental import pallas as pl
from jax.experimental.pallas import tpu as pltpu

LOG_SCALE_FACTOR = 3.0

# Per-block budget for the streamed (HBM-bandwidth-bound) kernels.  The affine
# pipeline holds ~4 blocks in flight (input + output, double-buffered), so
# 4 MiB blocks => ~16-20 MiB of pipeline VMEM: safe on v7x (64 MiB physical),
# and we raise the scoped limit explicitly for v5e (16 MiB default).
_BLOCK_BUDGET_BYTES = 4 * 1024 * 1024
_VMEM_SLACK_BYTES = 4 * 1024 * 1024
_VMEM_LIMIT_CAP = 48 * 1024 * 1024     # stay well under v7x's 64 MiB physical


# ---------------------------------------------------------------------------
# Tile selection helpers
# ---------------------------------------------------------------------------
def _round_up(x, m):
    return ((x + m - 1) // m) * m


def _sublane(dtype):
    """Sublane packing for dtype: 8 rows for f32, 16 for bf16, 32 for int8/fp8."""
    return max(8, 32 // jnp.dtype(dtype).itemsize)


def _pick_tiles(r, hw, dtype, budget=_BLOCK_BUDGET_BYTES):
    """Pick (row_tile, lane_tile) for an (r, hw) row-major view.

    Lane tile: full extent when hw is small, else a 128-multiple capped by the
    VMEM budget.  Row tile: multiple of the dtype's sublane packing, capped by
    the budget.  Grids use pl.cdiv so ragged shapes get masked tail tiles
    instead of an unbounded full-extent fallback.  If the grid would collapse
    to a single program, split one axis so v7x's two TensorCores both get work.
    """
    itemsize = jnp.dtype(dtype).itemsize
    sub = _sublane(dtype)

    if hw <= 512:
        thw = hw                                    # full extent: always legal
    else:
        max_lanes = max(128, (budget // (sub * itemsize)) // 128 * 128)
        thw = min(_round_up(hw, 128), max_lanes)

    max_rows = max(sub, (budget // (thw * itemsize)) // sub * sub)
    trows = min(_round_up(r, sub), max_rows)

    # Megacore (v7x): guarantee >= 2 programs along a "parallel" axis when the
    # problem can be split at all (no-op on v5e/v6e, which have one TC).
    if pl.cdiv(r, trows) * pl.cdiv(hw, thw) == 1:
        if r > sub:
            trows = _round_up(pl.cdiv(r, 2), sub)
        elif hw > 256:
            thw = _round_up(pl.cdiv(hw, 2), 128)
    return trows, thw


def _vmem_limit(pipeline_bytes):
    """Scoped-VMEM limit: pipeline footprint + compiler slack, clamped <48 MiB."""
    return int(min(max(pipeline_bytes + _VMEM_SLACK_BYTES, 16 * 1024 * 1024),
                   _VMEM_LIMIT_CAP))


# ---------------------------------------------------------------------------
# Kernel 1: per-row partial stats -> (sum, sumsq)   (ActNorm._init_parameters)
# ---------------------------------------------------------------------------
def _stats_kernel(x_ref, sum_ref, sumsq_ref, *, hw, thw):
    j = pl.program_id(1)                       # reduction axis (H*W tiles), last

    @pl.when(j == 0)
    def _():
        sum_ref[...] = jnp.zeros_like(sum_ref)
        sumsq_ref[...] = jnp.zeros_like(sumsq_ref)

    x = x_ref[...].astype(jnp.float32)         # (trows, thw)
    if hw % thw != 0:
        # Ragged lane tail: zero out-of-range lanes so they don't pollute sums.
        lane = jax.lax.broadcasted_iota(jnp.int32, x.shape, 1)
        x = jnp.where(lane + j * thw < hw, x, 0.0)
    sum_ref[...] += jnp.sum(x, axis=1, keepdims=True)       # (trows, 1)
    sumsq_ref[...] += jnp.sum(x * x, axis=1, keepdims=True)  # (trows, 1)


def actnorm_stats(x2d, batch):
    """x2d: (B*C, H*W) view of x -> (bias (C,), log_scale (C,)) float32."""
    r, hw = x2d.shape
    c = r // batch
    itemsize = jnp.dtype(x2d.dtype).itemsize
    trows, thw = _pick_tiles(r, hw, x2d.dtype)
    grid = (pl.cdiv(r, trows), pl.cdiv(hw, thw))
    block_bytes = trows * thw * itemsize
    cost = pl.CostEstimate(flops=3 * r * hw, transcendentals=0,
                           bytes_accessed=r * hw * itemsize + 2 * r * 4)
    sums, sumsqs = pl.pallas_call(
        functools.partial(_stats_kernel, hw=hw, thw=thw),
        out_shape=(jax.ShapeDtypeStruct((r, 1), jnp.float32),
                   jax.ShapeDtypeStruct((r, 1), jnp.float32)),
        grid_spec=pltpu.PrefetchScalarGridSpec(
            num_scalar_prefetch=0,
            grid=grid,
            in_specs=[pl.BlockSpec((trows, thw), lambda i, j: (i, j))],
            out_specs=(pl.BlockSpec((trows, 1), lambda i, j: (i, 0)),
                       pl.BlockSpec((trows, 1), lambda i, j: (i, 0))),
        ),
        compiler_params=pltpu.CompilerParams(
            dimension_semantics=("parallel", "arbitrary"),
            vmem_limit_bytes=_vmem_limit(2 * block_bytes + 4 * trows * 512)),
        cost_estimate=cost,
    )(x2d)
    # C-element finalize: fold the batch axis and derive bias / log_scale in
    # plain JAX (trivially cheap; keeps the kernel a pure streaming reduction).
    n = batch * hw
    sum_c = sums.reshape(batch, c).sum(axis=0)
    sumsq_c = sumsqs.reshape(batch, c).sum(axis=0)
    mean = sum_c / n
    # TODO(synk): one-pass E[x^2]-mean^2 can cancel for large-mean activations;
    # switch to shifted/Welford accumulation if init precision ever matters.
    var = jnp.maximum(sumsq_c / n - mean * mean, 0.0)
    log_scale = (-0.5 * jnp.log(var + 1e-6)) / LOG_SCALE_FACTOR
    return -mean, log_scale


# ---------------------------------------------------------------------------
# Kernel 2: affine transform  y = (x + shift) * scale   (per-row params)
# ---------------------------------------------------------------------------
def _affine_kernel(x_ref, shift_ref, scale_ref, y_ref):
    # shift/scale are (trows, 1) f32 columns broadcast along lanes; exp() is
    # hoisted (and cached) in the wrapper, so the streamed body is add + mul.
    y_ref[...] = ((x_ref[...] + shift_ref[...]) * scale_ref[...]).astype(y_ref.dtype)


def actnorm_affine(x2d, shift_col, scale_col):
    """x2d: (R, HW); shift_col/scale_col: (R, 1) float32 -> y2d: (R, HW)."""
    r, hw = x2d.shape
    itemsize = jnp.dtype(x2d.dtype).itemsize
    trows, thw = _pick_tiles(r, hw, x2d.dtype)
    grid = (pl.cdiv(r, trows), pl.cdiv(hw, thw))
    block_bytes = trows * thw * itemsize
    cost = pl.CostEstimate(flops=2 * r * hw, transcendentals=0,
                           bytes_accessed=2 * r * hw * itemsize + 2 * r * 4)
    # NOTE: the (trows, 1) param blocks only re-DMA when the row-block index
    # changes (the hw axis is inner), so they behave as effectively resident.
    # Pinning the whole (R, 1) column in VMEM would cost R*512 B after lane
    # padding, which does not scale for large B*C, so we keep the BlockSpec path.
    return pl.pallas_call(
        _affine_kernel,
        out_shape=jax.ShapeDtypeStruct((r, hw), x2d.dtype),
        grid_spec=pltpu.PrefetchScalarGridSpec(
            num_scalar_prefetch=0,
            grid=grid,
            in_specs=[
                pl.BlockSpec((trows, thw), lambda i, j: (i, j)),
                pl.BlockSpec((trows, 1), lambda i, j: (i, 0)),
                pl.BlockSpec((trows, 1), lambda i, j: (i, 0)),
            ],
            out_specs=pl.BlockSpec((trows, thw), lambda i, j: (i, j)),
        ),
        compiler_params=pltpu.CompilerParams(
            dimension_semantics=("parallel", "parallel"),
            vmem_limit_bytes=_vmem_limit(4 * block_bytes + 4 * trows * 512)),
        cost_estimate=cost,
    )(x2d, shift_col, scale_col)


# ---------------------------------------------------------------------------
# Plain-Python module wrapper mirroring the PyTorch ActNorm
# ---------------------------------------------------------------------------
class ActNorm:
    def __init__(self, n_channel):
        self.n_channel = n_channel
        self.log_scale_factor = LOG_SCALE_FACTOR
        # Deterministic parameter init (same as nn.Parameter(torch.zeros(...)))
        self.log_scale = jnp.zeros((1, n_channel, 1, 1), jnp.float32)
        self.bias = jnp.zeros((1, n_channel, 1, 1), jnp.float32)
        self.initialized = False
        self.training = True
        self._col_cache = {}     # (batch, inverse) -> (shift_col, scale_col)

    # TODO(synk): data-dependent init mutates Python state; keep init outside
    # jax.jit (jit would bake the initialization branch in at trace time).
    def _init_parameters(self, x):
        if not self.training:
            return
        b, c, h, w = x.shape
        bias, log_scale = actnorm_stats(x.reshape(b * c, h * w), b)
        self.bias = bias.reshape(1, c, 1, 1)
        self.log_scale = log_scale.reshape(1, c, 1, 1)
        self.initialized = True
        self._col_cache.clear()

    def _row_params(self, b, c, inverse=False):
        """Per-channel params expanded to per-row (B*C, 1) f32 columns (cached)."""
        key = (int(b), bool(inverse))
        cols = self._col_cache.get(key)
        if cols is None:
            bias = self.bias.reshape(c, 1).astype(jnp.float32)
            scale = jnp.exp(self.log_scale.reshape(c, 1).astype(jnp.float32)
                            * self.log_scale_factor)
            if inverse:
                shift, mult = -bias * scale, 1.0 / scale   # x = y/scale - bias
            else:
                shift, mult = bias, scale                  # y = (x + bias)*scale
            cols = (jnp.tile(shift, (b, 1)), jnp.tile(mult, (b, 1)))
            self._col_cache[key] = cols
        return cols

    def forward(self, x, logdet=None):
        if not self.initialized:
            self._init_parameters(x)
        assert x.shape[1] == self.n_channel, (
            f"Input n_channel {x.shape[1]} != defined n_channel {self.n_channel}"
        )
        b, c, h, w = x.shape
        shift_col, scale_col = self._row_params(b, c, inverse=False)
        y = actnorm_affine(x.reshape(b * c, h * w), shift_col, scale_col)
        y = y.reshape(b, c, h, w)
        if logdet is not None:
            return y, logdet + self.logdet(h, w)
        return y

    def reverse(self, y):
        b, c, h, w = y.shape
        shift_col, scale_col = self._row_params(b, c, inverse=True)
        x = actnorm_affine(y.reshape(b * c, h * w), shift_col, scale_col)
        return x.reshape(b, c, h, w)

    def logdet(self, h, w):
        # C-element scalar reduction: plain-JAX glue, not worth a kernel.
        return h * w * jnp.sum(self.log_scale * self.log_scale_factor)


# ---------------------------------------------------------------------------
def _reference_forward(x):
    mean = jnp.mean(x, axis=(0, 2, 3), keepdims=True)
    var = jnp.mean((x - mean) ** 2, axis=(0, 2, 3), keepdims=True)
    log_scale = jnp.log(1.0 / jnp.sqrt(var + 1e-6)) / LOG_SCALE_FACTOR
    bias = -mean
    y = (x + bias) * jnp.exp(log_scale * LOG_SCALE_FACTOR)
    h, w = x.shape[2:]
    dlogdet = h * w * jnp.sum(log_scale * LOG_SCALE_FACTOR)
    return y, dlogdet


if __name__ == "__main__":
    key0, key1 = jax.random.split(jax.random.PRNGKey(0))

    # --- primary check: aligned shape (dense, unmasked lane stores) ---------
    B, C, H, W = 2, 4, 16, 16
    x = jax.random.normal(key0, (B, C, H, W), dtype=jnp.float32) * 1.5 + 0.3

    model = ActNorm(n_channel=C)
    y, logdet = model.forward(x, logdet=jnp.float32(0.0))
    y = jax.block_until_ready(y)
    logdet = jax.block_until_ready(logdet)

    y_ref, logdet_ref = _reference_forward(x)
    assert y.shape == (B, C, H, W)
    assert jnp.allclose(y, y_ref, atol=1e-4, rtol=1e-4)
    assert jnp.allclose(logdet, logdet_ref, atol=1e-3, rtol=1e-4)

    # reverse() round-trips through the same affine kernel (cached params).
    x_rec = jax.block_until_ready(model.reverse(y))
    assert jnp.allclose(x_rec, x, atol=1e-4, rtol=1e-4)

    # --- ragged check: C not a multiple of 8, H*W not a multiple of 128 -----
    # exercises cdiv grids + masked tail tiles in both kernels.
    B2, C2, H2, W2 = 2, 3, 20, 30
    x2 = jax.random.normal(key1, (B2, C2, H2, W2), dtype=jnp.float32) * 0.7 - 0.2
    model2 = ActNorm(n_channel=C2)
    y2, logdet2 = model2.forward(x2, logdet=jnp.float32(0.0))
    y2 = jax.block_until_ready(y2)
    logdet2 = jax.block_until_ready(logdet2)
    y2_ref, logdet2_ref = _reference_forward(x2)
    assert jnp.allclose(y2, y2_ref, atol=1e-4, rtol=1e-4)
    assert jnp.allclose(logdet2, logdet2_ref, atol=1e-3, rtol=1e-4)

    print("KERNEL_OK")
</pallas_src>

<mosaic_0001>
module attributes {stable_mosaic.version = 11 : i64} {
  func.func @_stats_kernel(%arg0: i32, %arg1: i32, %arg2: memref<8x256xf32, #tpu.memory_space<vmem>>, %arg3: memref<8x1xf32, #tpu.memory_space<vmem>>, %arg4: memref<8x1xf32, #tpu.memory_space<vmem>>) attributes {dimension_semantics = [#tpu.dimension_semantics<parallel>, #tpu.dimension_semantics<arbitrary>], iteration_bounds = array<i64: 1, 1>, scalar_prefetch = 0 : i64, scratch_operands = 0 : i64, tpu.core_type = #tpu.core_type<tc>, window_params = [{transform_indices = @transform_0, window_bounds = array<i64: 8, 256>}, {transform_indices = @transform_1, window_bounds = array<i64: 8, 1>}, {transform_indices = @transform_2, window_bounds = array<i64: 8, 1>}]} {
    %c0_i32 = arith.constant 0 : i32
    %0 = arith.cmpi eq, %arg1, %c0_i32 : i32
    %1 = arith.extui %0 : i1 to i32
    %c0_i32_0 = arith.constant 0 : i32
    %2 = arith.cmpi ne, %1, %c0_i32_0 : i32
    scf.if %2 {
      %cst_11 = arith.constant 0.000000e+00 : f32
      %15 = vector.broadcast %cst_11 : f32 to vector<8x1xf32>
      %c0_12 = arith.constant 0 : index
      %c0_13 = arith.constant 0 : index
      %16 = vector.load %arg3[%c0_12, %c0_13] : memref<8x1xf32, #tpu.memory_space<vmem>>, vector<8x1xf32>
      tpu.vector_store %arg3[%c0_12, %c0_13], %15 {strides = array<i32>} : memref<8x1xf32, #tpu.memory_space<vmem>>, vector<8x1xf32>,
      %cst_14 = arith.constant 0.000000e+00 : f32
      %17 = vector.broadcast %cst_14 : f32 to vector<8x1xf32>
      %c0_15 = arith.constant 0 : index
      %c0_16 = arith.constant 0 : index
      %18 = vector.load %arg4[%c0_15, %c0_16] : memref<8x1xf32, #tpu.memory_space<vmem>>, vector<8x1xf32>
      tpu.vector_store %arg4[%c0_15, %c0_16], %17 {strides = array<i32>} : memref<8x1xf32, #tpu.memory_space<vmem>>, vector<8x1xf32>,
    } else {
    }
    %c0 = arith.constant 0 : index
    %c0_1 = arith.constant 0 : index
    %3 = vector.load %arg2[%c0, %c0_1] : memref<8x256xf32, #tpu.memory_space<vmem>>, vector<8x256xf32>
    %c0_2 = arith.constant 0 : index
    %c0_3 = arith.constant 0 : index
    %4 = vector.load %arg3[%c0_2, %c0_3] : memref<8x1xf32, #tpu.memory_space<vmem>>, vector<8x1xf32>
    %cst = arith.constant dense<0.000000e+00> : vector<8xf32>
    %5 = vector.multi_reduction <add>, %3, %cst [1] : vector<8x256xf32> to vector<8xf32>
    %6 = vector.shape_cast %5 : vector<8xf32> to vector<8x1xf32>
    %7 = arith.addf %4, %6 : vector<8x1xf32>
    %c0_4 = arith.constant 0 : index
    %c0_5 = arith.constant 0 : index
    %8 = vector.load %arg3[%c0_4, %c0_5] : memref<8x1xf32, #tpu.memory_space<vmem>>, vector<8x1xf32>
    tpu.vector_store %arg3[%c0_4, %c0_5], %7 {strides = array<i32>} : memref<8x1xf32, #tpu.memory_space<vmem>>, vector<8x1xf32>,
    %c0_6 = arith.constant 0 : index
    %c0_7 = arith.constant 0 : index
    %9 = vector.load %arg4[%c0_6, %c0_7] : memref<8x1xf32, #tpu.memory_space<vmem>>, vector<8x1xf32>
    %10 = arith.mulf %3, %3 : vector<8x256xf32>
    %cst_8 = arith.constant dense<0.000000e+00> : vector<8xf32>
    %11 = vector.multi_reduction <add>, %10, %cst_8 [1] : vector<8x256xf32> to vector<8xf32>
    %12 = vector.shape_cast %11 : vector<8xf32> to vector<8x1xf32>
    %13 = arith.addf %9, %12 : vector<8x1xf32>
    %c0_9 = arith.constant 0 : index
    %c0_10 = arith.constant 0 : index
    %14 = vector.load %arg4[%c0_9, %c0_10] : memref<8x1xf32, #tpu.memory_space<vmem>>, vector<8x1xf32>
    tpu.vector_store %arg4[%c0_9, %c0_10], %13 {strides = array<i32>} : memref<8x1xf32, #tpu.memory_space<vmem>>, vector<8x1xf32>,
    return
  }
  func.func @transform_0(%arg0: i32, %arg1: i32) -> (i32, i32) {
    %c0_i32 = arith.constant 0 : i32
    return %arg0, %arg1 : i32, i32
  }
  func.func @transform_1(%arg0: i32, %arg1: i32) -> (i32, i32) {
    %c0_i32 = arith.constant 0 : i32
    %c0_i32_0 = arith.constant 0 : i32
    return %arg0, %c0_i32 : i32, i32
  }
  func.func @transform_2(%arg0: i32, %arg1: i32) -> (i32, i32) {
    %c0_i32 = arith.constant 0 : i32
    %c0_i32_0 = arith.constant 0 : i32
    return %arg0, %c0_i32 : i32, i32
  }
}

</mosaic_0001>

<bundles_post_ra>
// kernel: tpu_custom_call.1
= control target key start
LH: loop header
LB: loop body
LE: loop exit
PB: predicated region body
PF: predicated region fallthrough
CT: control target
= control target key end

     0   :  { %8 = vsyncpa [#allocation3], 0  ;;  %s81_s9 = smov [#allocation2]   ;;  %s132_s0 = inlined_call_operand.hbm [shape: f32[8,256], index: 0, kind: input, shape index: {}]   ;;  %s133_s1 = inlined_call_operand.vmem [shape: f32[8,1], index: 1, kind: output, shape index: {0}]   ;;  %s134_s2 = inlined_call_operand.vmem [shape: f32[8,1], index: 2, kind: output, shape index: {1}]  }
   0x1   :  { %s15_s10 = sshll.u32 %s81_s9, 4  ;;  %s57_s13 = scalar_lea.hbm %s132_s0, 256  ;;  %s16_s10 = int_to_ptr.vmem [resolvable:$true] %s15_s10 }
   0x2   :  { %p58_p0 = scmp.ne.s32.totalorder %s132_s0, %s57_s13  ;;  %p61_p1 = scmp.lt.u32.totalorder %s57_s13, %s132_s0 }
   0x4   :  { %p63_p2 = pnand %p61_p1, %p58_p0 }
   0x6   :  { %66 = shalt.err (!%p63_p2)
}
   0x7   :  { %s67_s18 = scalar_lea.vmem %s16_s10, 256  ;;  %p72_p4 = scmp.lt.s32.totalorder %s16_s10, %s16_s10 }
   0x8   :  { %p68_p3 = scmp.ne.s32.totalorder %s16_s10, %s67_s18  ;;  %p73_p5 = scmp.lt.s32.totalorder %s67_s18, %s67_s18 }
   0xa   :  { %p74_p6 = por %p73_p5, %p72_p4 }
   0xc   :  { %p75_p7 = pnand %p74_p6, %p68_p3 }
   0xe   :  { %78 = shalt.err (!%p75_p7)
}
   0xf   :  { %18 = dma.hbm_to_vmem [thread:$0]  %s132_s0, 256, %s16_s10, [#allocation3]  }
  0x10   :  { %79 = dma.done.wait [#allocation3], 256  }
  0x11   :  { %80 = vsyncadd [#allocation3], 4294967040  ;;  %vm26_vm0 = vcmask 7168   ;;  %v82_v0 = vmov 0.0   ;;  %v29_v1 = vld [vmem:[#allocation2] sm:$0xff]  ;;  %v30_v2 = vld [vmem:[#allocation2 + $0x8] sm:$0xff] }
  0x12   :  { %27 = vst.msk [vmem:[%s133_s1] sm:$0xff] %vm26_vm0, %v82_v0  ;;  %28 = vst.msk [vmem:[%s134_s2] sm:$0xff] %vm26_vm0, %v82_v0  ;;  %v32_v3 = vadd.f32 %v30_v2, %v29_v1  ;;  %v39_v4 = vmul.f32 %v29_v1, %v29_v1  ;;  %v40_v5 = vmul.f32 %v30_v2, %v30_v2 }
  0x14   :  { %33 = vadd.xlane.f32.xlu0 %v32_v3  ;;  %v41_v6 = vadd.f32 %v40_v5, %v39_v4 }
  0x18   :  { %42 = vadd.xlane.f32.xlu0 %v41_v6 }
  0x19   :  { %v31_v7 = vld [vmem:[%s133_s1] sm:$0xff] }
  0x1a   :  { %v38_v10 = vld [vmem:[%s134_s2] sm:$0xff] }
  0xa1   :  { %v34_v8 = vpop.xlane.xlu0 %33 }
  0xa2   :  { %v35_v9 = vadd.f32 %v34_v8, %v31_v7 }
  0xa4   :  { %37 = vst.msk [vmem:[%s133_s1] sm:$0xff] %vm26_vm0, %v35_v9 }
  0xa5   :  { %v43_v11 = vpop.xlane.xlu0 %42 }
  0xa6   :  { %v44_v12 = vadd.f32 %v43_v11, %v38_v10 }
  0xa8   :  { %45 = vst.msk [vmem:[%s134_s2] sm:$0xff] %vm26_vm0, %v44_v12 }
  0xa9   :  { %54 = vsyncpa [#allocation3], 1 }

</bundles_post_ra>
